<compile_context>
chip_gen: v7x
topology: tpu7x:2x2x1
jax: 0.10.0
libtpu: 0.0.40
codegen_flags: <defaults>
</compile_context>

<pallas_src>
import functools

import jax
import jax.numpy as jnp
from jax.experimental import pallas as pl
from jax.experimental.pallas import tpu as pltpu

_INV_SQRT2 = 0.7071067811865476
_SQRT_2_OVER_PI = 0.7978845608028654


def _round_up(x, m):
    return (x + m - 1) // m * m


def _ffn_kernel(x_ref, w1_ref, b1_ref, w2_ref, b2_ref, o_ref, acc_ref,
                *, gelu_approx):
    # x_ref:  (tm, E)   bf16 token tile
    # w1_ref: (E, tH)   bf16 c_fc weight H-tile
    # b1_ref: (1, tH)   f32  c_fc bias  H-tile
    # w2_ref: (tH, E)   bf16 c_proj weight H-tile
    # b2_ref: (1, E)    f32  c_proj bias
    # o_ref:  (tm, E)   output tile (resident across the reduction axis)
    # acc_ref:(tm, E)   f32 VMEM accumulator scratch
    k = pl.program_id(1)  # hidden-dim reduction step (last grid axis)

    @pl.when(k == 0)
    def _init():
        acc_ref[...] = jnp.zeros_like(acc_ref)

    # c_fc partial: bf16 x bf16 -> f32 on the MXU, bias added once per H-tile.
    h = jnp.dot(x_ref[...], w1_ref[...], preferred_element_type=jnp.float32)
    h = h + b1_ref[...]

    if gelu_approx:
        # tanh approximation (EUP path) == nn.GELU(approximate='tanh')
        h = 0.5 * h * (1.0 + jnp.tanh(_SQRT_2_OVER_PI *
                                      (h + 0.044715 * h * h * h)))
    else:
        # exact erf GELU == nn.GELU() default (bit-exact semantics of the module)
        h = 0.5 * h * (1.0 + jax.lax.erf(h * _INV_SQRT2))

    # c_proj partial: accumulate this H-tile's contribution in f32.
    acc_ref[...] += jnp.dot(h.astype(w2_ref.dtype), w2_ref[...],
                            preferred_element_type=jnp.float32)

    @pl.when(k == pl.num_programs(1) - 1)
    def _finalize():
        # b2 added once per output tile; dropout is eval-mode identity.
        o_ref[...] = (acc_ref[...] + b2_ref[...]).astype(o_ref.dtype)


def feed_forward(x, w1_t, b1, w2_t, b2, *, tm=256, th=512, gelu_approx=False):
    """x: (B, T, E) float32.  w1_t: (E, 4E), w2_t: (4E, E).  Returns (B, T, E)."""
    B, T, E = x.shape
    H = w1_t.shape[1]
    assert w1_t.shape == (E, H) and w2_t.shape == (H, E)
    assert b1.shape == (H,) and b2.shape == (E,)
    # Lane-dense feature dims (output last dim < 128 would force masked stores).
    assert E % 128 == 0 and H % 128 == 0, "pad emb/hidden dims to multiples of 128"

    M = B * T
    tm_eff = min(tm, _round_up(M, 16))     # bf16 min sublane tile is 16
    M_pad = _round_up(M, tm_eff)
    th_eff = min(th, H)
    assert H % th_eff == 0

    x2d = x.reshape(M, E)
    if M_pad != M:
        x2d = jnp.pad(x2d, ((0, M_pad - M), (0, 0)))

    # bf16 operands for the MXU; accumulation stays f32 inside the kernel.
    x_bf = x2d.astype(jnp.bfloat16)
    w1_bf = w1_t.astype(jnp.bfloat16)
    w2_bf = w2_t.astype(jnp.bfloat16)
    b1_2d = b1.reshape(1, H).astype(jnp.float32)
    b2_2d = b2.reshape(1, E).astype(jnp.float32)

    kernel = functools.partial(_ffn_kernel, gelu_approx=gelu_approx)

    out2d = pl.pallas_call(
        kernel,
        out_shape=jax.ShapeDtypeStruct((M_pad, E), x.dtype),
        grid_spec=pltpu.PrefetchScalarGridSpec(
            num_scalar_prefetch=0,
            grid=(M_pad // tm_eff, H // th_eff),      # reduction axis last
            in_specs=[
                pl.BlockSpec((tm_eff, E), lambda i, k: (i, 0)),   # x tile
                pl.BlockSpec((E, th_eff), lambda i, k: (0, k)),   # W1 H-tile
                pl.BlockSpec((1, th_eff), lambda i, k: (0, k)),   # b1 H-tile
                pl.BlockSpec((th_eff, E), lambda i, k: (k, 0)),   # W2 H-tile
                pl.BlockSpec((1, E),      lambda i, k: (0, 0)),   # b2 (tiny)
            ],
            out_specs=pl.BlockSpec((tm_eff, E), lambda i, k: (i, 0)),
            scratch_shapes=[pltpu.VMEM((tm_eff, E), jnp.float32)],
        ),
        compiler_params=pltpu.CompilerParams(
            dimension_semantics=("parallel", "arbitrary"),
            vmem_limit_bytes=48 * 1024 * 1024,   # > v5e's 16 MiB default, < v7x's 64 MiB
        ),
    )(x_bf, w1_bf, b1_2d, w2_bf, b2_2d)

    return out2d[:M].reshape(B, T, E)


def init_params(key, emb_dim):
    """Deterministic init matching nn.Linear shapes (uniform +/- 1/sqrt(fan_in))."""
    hidden = 4 * emb_dim
    k1, k2, k3, k4 = jax.random.split(key, 4)
    lim1 = 1.0 / (emb_dim ** 0.5)
    lim2 = 1.0 / (hidden ** 0.5)
    # PyTorch stores weight as (out, in); we keep the transposed (in, out) layout.
    w1_t = jax.random.uniform(k1, (emb_dim, hidden), jnp.float32, -lim1, lim1)
    b1 = jax.random.uniform(k2, (hidden,), jnp.float32, -lim1, lim1)
    w2_t = jax.random.uniform(k3, (hidden, emb_dim), jnp.float32, -lim2, lim2)
    b2 = jax.random.uniform(k4, (emb_dim,), jnp.float32, -lim2, lim2)
    return w1_t, b1, w2_t, b2


if __name__ == "__main__":
    # Small but lane-aligned shapes: hidden = 4*emb_dim = 512.
    batch, seq, emb_dim = 2, 128, 128

    key = jax.random.PRNGKey(0)
    kx, kp = jax.random.split(key)
    x = jax.random.normal(kx, (batch, seq, emb_dim), jnp.float32)
    w1_t, b1, w2_t, b2 = init_params(kp, emb_dim)

    # Small tiles here so the demo exercises both grid axes (2 M-steps x 2 H-steps);
    # production callers keep the defaults (tm=256, th=512).
    out = feed_forward(x, w1_t, b1, w2_t, b2, tm=128, th=256)
    jax.block_until_ready(out)

    # Plain-JAX reference with matching bf16-operand / f32-accumulate numerics.
    x2d = x.reshape(-1, emb_dim).astype(jnp.bfloat16)
    h_ref = jnp.dot(x2d, w1_t.astype(jnp.bfloat16),
                    preferred_element_type=jnp.float32) + b1
    h_ref = 0.5 * h_ref * (1.0 + jax.lax.erf(h_ref * _INV_SQRT2))
    y_ref = jnp.dot(h_ref.astype(jnp.bfloat16), w2_t.astype(jnp.bfloat16),
                    preferred_element_type=jnp.float32) + b2
    y_ref = y_ref.reshape(batch, seq, emb_dim)

    assert out.shape == (batch, seq, emb_dim)
    assert jnp.allclose(out, y_ref, atol=2e-3, rtol=2e-3), \
        float(jnp.max(jnp.abs(out - y_ref)))

    print("KERNEL_OK")
</pallas_src>

<mosaic_0001>
module attributes {stable_mosaic.version = 11 : i64} {
  func.func @_ffn_kernel(%arg0: i32, %arg1: i32, %arg2: memref<128x128xbf16, #tpu.memory_space<vmem>>, %arg3: memref<128x256xbf16, #tpu.memory_space<vmem>>, %arg4: memref<1x256xf32, #tpu.memory_space<vmem>>, %arg5: memref<256x128xbf16, #tpu.memory_space<vmem>>, %arg6: memref<1x128xf32, #tpu.memory_space<vmem>>, %arg7: memref<128x128xf32, #tpu.memory_space<vmem>>, %arg8: memref<128x128xf32, #tpu.memory_space<vmem>>) attributes {dimension_semantics = [#tpu.dimension_semantics<parallel>, #tpu.dimension_semantics<arbitrary>], iteration_bounds = array<i64: 2, 2>, scalar_prefetch = 0 : i64, scratch_operands = 1 : i64, tpu.core_type = #tpu.core_type<tc>, window_params = [{transform_indices = @transform_0, window_bounds = array<i64: 128, 128>}, {transform_indices = @transform_1, window_bounds = array<i64: 128, 256>}, {transform_indices = @transform_2, window_bounds = array<i64: 1, 256>}, {transform_indices = @transform_3, window_bounds = array<i64: 256, 128>}, {pipeline_mode = #tpu.pipeline_mode<synchronous>, transform_indices = @transform_4, window_bounds = array<i64: 1, 128>}, {transform_indices = @transform_5, window_bounds = array<i64: 128, 128>}]} {
    %c0_i32 = arith.constant 0 : i32
    %0 = arith.cmpi eq, %arg1, %c0_i32 : i32
    %1 = arith.extui %0 : i1 to i32
    %c0_i32_0 = arith.constant 0 : i32
    %2 = arith.cmpi ne, %1, %c0_i32_0 : i32
    scf.if %2 {
      %cst_17 = arith.constant 0.000000e+00 : f32
      %26 = vector.broadcast %cst_17 : f32 to vector<128x128xf32>
      %c0_18 = arith.constant 0 : index
      %c0_19 = arith.constant 0 : index
      %27 = vector.load %arg8[%c0_18, %c0_19] : memref<128x128xf32, #tpu.memory_space<vmem>>, vector<128x128xf32>
      tpu.vector_store %arg8[%c0_18, %c0_19], %26 {strides = array<i32>} : memref<128x128xf32, #tpu.memory_space<vmem>>, vector<128x128xf32>,
    } else {
    }
    %c0 = arith.constant 0 : index
    %c0_1 = arith.constant 0 : index
    %3 = vector.load %arg2[%c0, %c0_1] : memref<128x128xbf16, #tpu.memory_space<vmem>>, vector<128x128xbf16>
    %c0_2 = arith.constant 0 : index
    %c0_3 = arith.constant 0 : index
    %4 = vector.load %arg3[%c0_2, %c0_3] : memref<128x256xbf16, #tpu.memory_space<vmem>>, vector<128x256xbf16>
    %cst = arith.constant dense<0.000000e+00> : vector<128x256xf32>
    %5 = tpu.matmul %3, %4, %cst {dimension_numbers = #tpu.dot_dimension_numbers<[1], [0], [0], [1], [0, 0, 1, 1], [], []>} : vector<128x128xbf16>, vector<128x256xbf16>, vector<128x256xf32> -> vector<128x256xf32>
    %c0_4 = arith.constant 0 : index
    %c0_5 = arith.constant 0 : index
    %6 = vector.load %arg4[%c0_4, %c0_5] : memref<1x256xf32, #tpu.memory_space<vmem>>, vector<1x256xf32>
    %7 = vector.broadcast %6 : vector<1x256xf32> to vector<128x256xf32>
    %8 = arith.addf %5, %7 : vector<128x256xf32>
    %cst_6 = arith.constant 5.000000e-01 : f32
    %9 = vector.broadcast %cst_6 : f32 to vector<128x256xf32>
    %10 = arith.mulf %9, %8 : vector<128x256xf32>
    %cst_7 = arith.constant 0.707106769 : f32
    %11 = vector.broadcast %cst_7 : f32 to vector<128x256xf32>
    %12 = arith.mulf %8, %11 : vector<128x256xf32>
    %13 = math.erf %12 : vector<128x256xf32>
    %cst_8 = arith.constant 1.000000e+00 : f32
    %14 = vector.broadcast %cst_8 : f32 to vector<128x256xf32>
    %15 = arith.addf %14, %13 : vector<128x256xf32>
    %16 = arith.mulf %10, %15 : vector<128x256xf32>
    %c0_9 = arith.constant 0 : index
    %c0_10 = arith.constant 0 : index
    %17 = vector.load %arg8[%c0_9, %c0_10] : memref<128x128xf32, #tpu.memory_space<vmem>>, vector<128x128xf32>
    %18 = arith.truncf %16 : vector<128x256xf32> to vector<128x256xbf16>
    %c0_11 = arith.constant 0 : index
    %c0_12 = arith.constant 0 : index
    %19 = vector.load %arg5[%c0_11, %c0_12] : memref<256x128xbf16, #tpu.memory_space<vmem>>, vector<256x128xbf16>
    %cst_13 = arith.constant dense<0.000000e+00> : vector<128x128xf32>
    %20 = tpu.matmul %18, %19, %cst_13 {dimension_numbers = #tpu.dot_dimension_numbers<[1], [0], [0], [1], [0, 0, 1, 1], [], []>} : vector<128x256xbf16>, vector<256x128xbf16>, vector<128x128xf32> -> vector<128x128xf32>
    %21 = arith.addf %17, %20 : vector<128x128xf32>
    %c0_14 = arith.constant 0 : index
    %c0_15 = arith.constant 0 : index
    %22 = vector.load %arg8[%c0_14, %c0_15] : memref<128x128xf32, #tpu.memory_space<vmem>>, vector<128x128xf32>
    tpu.vector_store %arg8[%c0_14, %c0_15], %21 {strides = array<i32>} : memref<128x128xf32, #tpu.memory_space<vmem>>, vector<128x128xf32>,
    %c1_i32 = arith.constant 1 : i32
    %23 = arith.cmpi eq, %arg1, %c1_i32 : i32
    %24 = arith.extui %23 : i1 to i32
    %c0_i32_16 = arith.constant 0 : i32
    %25 = arith.cmpi ne, %24, %c0_i32_16 : i32
    scf.if %25 {
      %c0_17 = arith.constant 0 : index
      %c0_18 = arith.constant 0 : index
      %26 = vector.load %arg8[%c0_17, %c0_18] : memref<128x128xf32, #tpu.memory_space<vmem>>, vector<128x128xf32>
      %c0_19 = arith.constant 0 : index
      %c0_20 = arith.constant 0 : index
      %27 = vector.load %arg6[%c0_19, %c0_20] : memref<1x128xf32, #tpu.memory_space<vmem>>, vector<1x128xf32>
      %28 = vector.broadcast %27 : vector<1x128xf32> to vector<128x128xf32>
      %29 = arith.addf %26, %28 : vector<128x128xf32>
      %c0_21 = arith.constant 0 : index
      %c0_22 = arith.constant 0 : index
      %30 = vector.load %arg7[%c0_21, %c0_22] : memref<128x128xf32, #tpu.memory_space<vmem>>, vector<128x128xf32>
      tpu.vector_store %arg7[%c0_21, %c0_22], %29 {strides = array<i32>} : memref<128x128xf32, #tpu.memory_space<vmem>>, vector<128x128xf32>,
    } else {
    }
    return
  }
  func.func @transform_0(%arg0: i32, %arg1: i32) -> (i32, i32) {
    %c0_i32 = arith.constant 0 : i32
    %c0_i32_0 = arith.constant 0 : i32
    return %arg0, %c0_i32 : i32, i32
  }
  func.func @transform_1(%arg0: i32, %arg1: i32) -> (i32, i32) {
    %c0_i32 = arith.constant 0 : i32
    %c0_i32_0 = arith.constant 0 : i32
    return %c0_i32, %arg1 : i32, i32
  }
  func.func @transform_2(%arg0: i32, %arg1: i32) -> (i32, i32) {
    %c0_i32 = arith.constant 0 : i32
    %c0_i32_0 = arith.constant 0 : i32
    return %c0_i32, %arg1 : i32, i32
  }
  func.func @transform_3(%arg0: i32, %arg1: i32) -> (i32, i32) {
    %c0_i32 = arith.constant 0 : i32
    %c0_i32_0 = arith.constant 0 : i32
    return %arg1, %c0_i32 : i32, i32
  }
  func.func @transform_4(%arg0: i32, %arg1: i32) -> (i32, i32) {
    %c0_i32 = arith.constant 0 : i32
    %c0_i32_0 = arith.constant 0 : i32
    %c0_i32_1 = arith.constant 0 : i32
    return %c0_i32, %c0_i32_0 : i32, i32
  }
  func.func @transform_5(%arg0: i32, %arg1: i32) -> (i32, i32) {
    %c0_i32 = arith.constant 0 : i32
    %c0_i32_0 = arith.constant 0 : i32
    return %arg0, %c0_i32 : i32, i32
  }
}

</mosaic_0001>

<bundles_post_ra>
// kernel: tpu_custom_call.1
= control target key start
LH: loop header
LB: loop body
LE: loop exit
PB: predicated region body
PF: predicated region fallthrough
CT: control target
= control target key end

     0   :  { %s2479_s0 = inlined_call_operand.hbm [shape: bf16[256,128], index: 0, kind: input, shape index: {}]   ;;  %s2480_s1 = inlined_call_operand.hbm [shape: bf16[128,512], index: 1, kind: input, shape index: {}]   ;;  %s2481_s2 = inlined_call_operand.vmem [shape: f32[1,512], index: 2, kind: input, shape index: {}]   ;;  %s2482_s3 = inlined_call_operand.hbm [shape: bf16[512,128], index: 3, kind: input, shape index: {}]   ;;  %s2483_s4 = inlined_call_operand.vmem [shape: f32[1,128], index: 4, kind: input, shape index: {}]   ;;  %s2484_s5 = inlined_call_operand.hbm [shape: f32[256,128], index: 5, kind: output, shape index: {}]  }
   0x1   :  { %2497 = sst [smem:[#allocation21_spill]] %s2480_s1 }
   0x2   :  { %2498 = sst [smem:[#allocation22_spill]] %s2483_s4 }
   0x3   :  { %2499 = sst [smem:[#allocation23_spill]] %s2484_s5 }
   0x4   :  { %10 = vsyncpa [#allocation4], 0 }
   0x5   :  { %12 = vsyncpa [#allocation4 + $0x1], 0 }
   0x6   :  { %13 = vsyncpa [#allocation7], 0 }
   0x7   :  { %15 = vsyncpa [#allocation7 + $0x1], 0 }
   0x8   :  { %16 = vsyncpa [#allocation5], 0 }
   0x9   :  { %18 = vsyncpa [#allocation5 + $0x1], 0  ;;  %s1948_s18 = smov 0   ;;  %s1950_s19 = smov 0  }
   0xa   :  { %s1952_s20 = smov 0   ;;  %s1954_s21 = smov 0  }
   0xb   :  { %s1956_s22 = smov 0   ;;  %s1958_s23 = smov 0  }
   0xc   :  { %s1960_s24 = smov 0   ;;  %s1962_s25 = smov 0  }
   0xd   :  { %s1964_s26 = smov 0   ;;  %s1966_s27 = smov 0  }
   0xe   :  { %s1968_s28 = smov 0  }
   0xf LB: > { %2500 = sst [smem:[#allocation13_spill]] %s1871_s20  ;;  %s33_s29 = sadd.s32 1, %s1895_s26  ;;  %s1903_s28 = sphi %s1968_s28, %s24_s28   ;;  %s1899_s27 = sphi %s1966_s27, %s2538_s27   ;;  %s1895_s26 = sphi %s1964_s26, %s2544_s26   ;;  %s1891_s25 = sphi %s1962_s25, %s2536_s25   ;;  %s1887_s24 = sphi %s1960_s24, %s2543_s24   ;;  %s1883_s23 = sphi %s1958_s23, %s2535_s23   ;;  %s1879_s22 = sphi %s1956_s22, %s2542_s22   ;;  %s1875_s21 = sphi %s1954_s21, %s2541_s21   ;;  %s1871_s20 = sphi %s1952_s20, %s2533_s20   ;;  %s1867_s19 = sphi %s1950_s19, %s2540_s19   ;;  %s1863_s18 = sphi %s1948_s18, %s2539_s18  }
  0x10   : > { %2501 = sst [smem:[#allocation14_spill]] %s1883_s23  ;;  %p2487_p0 = scmp.eq.s32.totalorder %s1903_s28, 0 }
  0x11   : > { %2502 = sst [smem:[#allocation15_spill]] %s1891_s25  ;;  %p2005_p1 = scmp.ge.s32.totalorder %s33_s29, 2 }
  0x12   : > { %2503 = sst [smem:[#allocation16_spill]] %s1899_s27  ;;  %s69_s6 = sadd.s32 1, %s1871_s20 }
  0x13   : > { %p76_p2 = scmp.ne.s32.totalorder %s1871_s20, %s1867_s19  ;;  %s2546_s29 = smov (%p2005_p1, %s33_s29), 0 }
  0x14   : > { %2505 = sst [smem:[#allocation17_spill]] %s2546_s29  ;;  %s66_s7 = ssub.s32 %s1895_s26, %s2546_s29 }
  0x15   : > { %p78_p4 = por %p76_p2, %p2487_p0  ;;  %p2486_p5 = scmp.lt.s32.totalorder %s1903_s28, 4 }
  0x16   : > { %p67_p6 = scmp.eq.s32.totalorder %s66_s7, 0  ;;  %s229_s8 = sand.u32 1, %s1903_s28  }
  0x17   : > { %s231_s9 = sand.u32 1, %s1871_s20   ;;  %s1387_s12 = sshll.u32 %s1895_s26, 7 }
  0x18   : > { %s2026_s10 = scalar_select %p67_p6, %s1871_s20, %s69_s6  }
  0x19   : > { %s2028_s11 = sshll.u32 %s231_s9, 7  ;;  %s2507_s1 = sld [smem:[#allocation21_spill]] }
  0x1a   : > { %2506 = sst [smem:[#allocation18_spill]] %s2026_s10  ;;  %s233_s16 = scalar_lea.vmem [#allocation6], %s2028_s11 }
  0x1b   : > { %s240_s17 = sshll.u32 %s233_s16, 4  ;;  %p2039_p7 = pnand %p2486_p5, %p78_p4  ;;  %s2043_s17 = int_to_ptr.vmem [resolvable:$true] %s240_s17 }
  0x1c   : > { %s2046_s6 = scalar_lea.sflag [#allocation7], %s229_s8 }
  0x1d   : > { %p2488_p10 = pneg %p2039_p7 }
  0x1f   : > { %s2034_s15 = scalar_lea.hbm %s2507_s1, %s1387_s12  ;;  %s1692_s14 = scalar_lea.hbm %s2507_s1, 4096 }
  0x20   : > { %s1687_s9 = scalar_lea.hbm %s2034_s15, 2048  ;;  %p1693_p13 = scmp.lt.u32.totalorder %s2034_s15, %s2507_s1 }
  0x21   : > { %p1688_p9 = scmp.ne.s32.totalorder %s2034_s15, %s1687_s9  ;;  %p1694_p2 = scmp.lt.u32.totalorder %s1692_s14, %s1687_s9 }
  0x22   : > { %p1696_p6 = scmp.lt.u32.totalorder %s1687_s9, %s2034_s15 }
  0x23   : > { %p1690_p11 = pnand %p2488_p10, %p1688_p9  ;;  %p1695_p4 = por %p1694_p2, %p1693_p13 }
  0x25   : > { %p1691_p12 = pneg %p1690_p11  ;;  %p1697_p5 = por %p1696_p6, %p1695_p4 }
  0x27   : > { %p1698_p3 = pnand %p1697_p5, %p1691_p12 }
  0x29   : > { %1701 = shalt.err (!%p1698_p3)
}
  0x2a   : > { %s1702_s8 = scalar_lea.vmem %s2043_s17, 2048  ;;  %s1905_s12 = smov [#allocation6]  }
  0x2b   : > { %p1703_p9 = scmp.ne.s32.totalorder %s2043_s17, %s1702_s8  ;;  %s1707_s13 = sshll.u32 %s1905_s12, 4  ;;  %s1708_s13 = int_to_ptr.vmem [resolvable:$false] %s1707_s13 }
  0x2c   : > { %s1709_s29 = scalar_lea.vmem %s1708_s13, 4096  ;;  %p1710_p8 = scmp.lt.s32.totalorder %s2043_s17, %s1708_s13 }
  0x2d   : > { %p1705_p11 = pnand %p1703_p9, %p2488_p10  ;;  %p1711_p13 = scmp.lt.s32.totalorder %s1709_s29, %s1702_s8 }
  0x2f   : > { %p1706_p0 = pneg %p1705_p11  ;;  %p1712_p2 = por %p1711_p13, %p1710_p8 }
  0x31   : > { %p1713_p4 = pnand %p1712_p2, %p1706_p0 }
  0x33   : > { %1716 = shalt.err (!%p1713_p4)
}
  0x34   : > { %s1906_s9 = smov 256   ;;  %s1907_s14 = smov 128  }
  0x35   : > { %s1908_s16 = smov 8   ;;  %p277_p0 = scmp.lt.s32.totalorder %s1903_s28, 5 }
  0x36   : > { %1468 = dma.hbm_to_vmem [thread:$0]  (!%p2039_p7), %s2034_s15, 2048, %s2043_s17, %s2046_s6, %s1906_s9, %s1907_s14, %s1908_s16  }
  0x37   : > { %p2509_p3 = scmp.ge.s32.totalorder %s1903_s28, 1  ;;  %s2082_s12 = sadd.s32 4294967295, %s1903_s28  }
  0x38   : > { %s1320_s13 = sadd.s32 4294967294, %s1903_s28   ;;  %s36_s29 = sadd.s32 1, %s1899_s27 }
  0x39   : > { %p2077_p5 = pnand %p2509_p3, %p277_p0  ;;  %s43_s1 = sadd.s32 1, %s1883_s23 }
  0x3a   : > { %s2548_s29 = smov (!%p2005_p1, %s36_s29), %s1899_s27  ;;  %p50_p8 = scmp.ne.s32.totalorder %s1883_s23, %s1879_s22 }
  0x3b   : > { %s2510_s8 = scalar_select %p2077_p5, 1, 0 }
  0x3c   : > { %p56_p12 = scmp.ne.s32.totalorder %s1879_s22, %s1875_s21  ;;  %p38_p6 = scmp.ge.s32.totalorder %s2548_s29, 2 }
  0x3d   : > { %p57_p9 = scmp.eq.s32.totalorder %s2082_s12, 0  ;;  %p2511_p11 = scmp.eq.s32.totalorder %s1903_s28, 0 }
  0x3e   : > { %p179_p2 = scmp.eq.s32.totalorder %s2082_s12, 3  ;;  %s2550_s29 = smov (%p38_p6, %s2548_s29), 0 }
  0x3f   : > { %p2097_p13 = por %p2511_p11, %p50_p8  ;;  %2513 = sst [smem:[#allocation19_spill]] %s2550_s29 }
  0x40   : > { %p2107_p1 = por %p57_p9, %p56_p12  ;;  %p2515_p4 = scmp.ne.s32.totalorder %s1867_s19, %s1863_s18 }
  0x41   : > { %s40_s9 = ssub.s32 %s1899_s27, %s2550_s29  ;;  %p2120_p3 = por %p179_p2, %p50_p8 }
  0x42   : > { %s2514_s30 = scalar_select %p2107_p1, 1, 0 }
  0x43   : > { %p2114_p0 = por %p2515_p4, %p57_p9  ;;  %p41_p11 = scmp.eq.s32.totalorder %s40_s9, 0 }
  0x44   : > { %s2517_s14 = scalar_select %p2120_p3, 1, 0 }
  0x45   : > { %s2516_s17 = scalar_select %p2114_p0, 1, 0 }
  0x46   : > { %p185_p10 = scmp.eq.s32.totalorder %s1320_s13, 3  ;;  %s208_s16 = sand.u32 1, %s1883_s23  }
  0x47   : > { %s1386_s10 = sshll.u32 %s1899_s27, 10  ;;  %s1323_s18 = sshll.u32 %s208_s16, 6 }
  0x48   : > { %s2127_s20 = scalar_select %p41_p11, %s1883_s23, %s43_s1  }
  0x49   : > { %p2132_p6 = por %p185_p10, %p56_p12  ;;  %s2139_s29 = scalar_lea.hbm %s2479_s0, %s1386_s10 }
  0x4a   : > { %2518 = sst [smem:[#allocation20_spill]] %s2127_s20  ;;  %p2520_p8 = scmp.lt.s32.totalorder %s1903_s28, 4 }
  0x4b   : > { %s2519_s5 = scalar_select %p2132_p6, 1, 0 }
  0x4c   : > { %p2145_p9 = pnand %p2520_p8, %p2097_p13  ;;  %s212_s13 = scalar_lea.vmem [#allocation3], %s1323_s18 }
  0x4d   : > { %s219_s9 = sshll.u32 %s212_s13, 4  ;;  %s2151_s27 = scalar_lea.sflag [#allocation4], %s208_s16  ;;  %s2149_s9 = int_to_ptr.vmem [resolvable:$true] %s219_s9 }
  0x4e   : > { %s1717_s4 = scalar_lea.hbm %s2139_s29, 1024  ;;  %p1719_p12 = pneg %p2145_p9 }
  0x4f   : > { %p1718_p10 = scmp.ne.s32.totalorder %s2139_s29, %s1717_s4  ;;  %s1722_s15 = scalar_lea.hbm %s2479_s0, 2048 }
  0x50   : > { %p1723_p13 = scmp.lt.u32.totalorder %s2139_s29, %s2479_s0  ;;  %p1724_p11 = scmp.lt.u32.totalorder %s1722_s15, %s1717_s4 }
  0x51   : > { %p1720_p2 = pnand %p1719_p12, %p1718_p10  ;;  %p1726_p6 = scmp.lt.u32.totalorder %s1717_s4, %s2139_s29 }
  0x52   : > { %p1725_p8 = por %p1724_p11, %p1723_p13 }
  0x53   : > { %p1721_p4 = pneg %p1720_p2 }
  0x54   : > { %p1727_p3 = por %p1726_p6, %p1725_p8 }
  0x56   : > { %p1728_p0 = pnand %p1727_p3, %p1721_p4 }
  0x58   : > { %1731 = shalt.err (!%p1728_p0)
}
  0x59   : > { %s1732_s16 = scalar_lea.vmem %s2149_s9, 1024  ;;  %s1909_s18 = smov [#allocation3]  }
  0x5a   : > { %p1733_p10 = scmp.ne.s32.totalorder %s2149_s9, %s1732_s16  ;;  %s1737_s13 = sshll.u32 %s1909_s18, 4  ;;  %s1738_s13 = int_to_ptr.vmem [resolvable:$false] %s1737_s13 }
  0x5b   : > { %s1739_s20 = scalar_lea.vmem %s1738_s13, 2048  ;;  %p1740_p5 = scmp.lt.s32.totalorder %s2149_s9, %s1738_s13 }
  0x5c   : > { %p1735_p2 = pnand %p1733_p10, %p1719_p12  ;;  %p1741_p13 = scmp.lt.s32.totalorder %s1739_s20, %s1732_s16 }
  0x5e   : > { %p1736_p1 = pneg %p1735_p2  ;;  %p1742_p11 = por %p1741_p13, %p1740_p5 }
  0x60   : > { %p1743_p6 = pnand %p1742_p11, %p1736_p1 }
  0x62   : > { %1746 = shalt.err (!%p1743_p6)
}
  0x63   : > { %s1910_s23 = smov 64   ;;  %s1911_s4 = smov 4  }
  0x64   : > { %1465 = dma.hbm_to_vmem [thread:$0]  (!%p2145_p9), %s2139_s29, 1024, %s2149_s9, %s2151_s27, %s1910_s23, %s1910_s23, %s1911_s4  }
  0x65   : > { %s1388_s25 = sshll.u32 %s1895_s26, 11  ;;  %s262_s10 = scalar_lea.vmem [#allocation8], %s2028_s11 }
  0x66   : > { %s269_s15 = sshll.u32 %s262_s10, 4  ;;  %s2187_s13 = scalar_lea.hbm %s2482_s3, %s1388_s25  ;;  %s2189_s15 = int_to_ptr.vmem [resolvable:$true] %s269_s15 }
  0x67   : > { %s1747_s20 = scalar_lea.hbm %s2187_s13, 2048  ;;  %p2522_p1 = pneg %p2039_p7 }
  0x68   : > { %p1748_p5 = scmp.ne.s32.totalorder %s2187_s13, %s1747_s20  ;;  %s1752_s29 = scalar_lea.hbm %s2482_s3, 4096 }
  0x69   : > { %p1753_p9 = scmp.lt.u32.totalorder %s2187_s13, %s2482_s3  ;;  %p1754_p12 = scmp.lt.u32.totalorder %s1752_s29, %s1747_s20 }
  0x6a   : > { %p1750_p0 = pnand %p1748_p5, %p2522_p1  ;;  %p1756_p8 = scmp.lt.u32.totalorder %s1747_s20, %s2187_s13 }
  0x6b   : > { %p1755_p4 = por %p1754_p12, %p1753_p9 }
  0x6c   : > { %p1751_p3 = pneg %p1750_p0 }
  0x6d   : > { %p1757_p10 = por %p1756_p8, %p1755_p4 }
  0x6f   : > { %p1758_p2 = pnand %p1757_p10, %p1751_p3 }
  0x71   : > { %1761 = shalt.err (!%p1758_p2)
}
  0x72   : > { %s1762_s25 = scalar_lea.vmem %s2189_s15, 2048  ;;  %p2523_p11 = pmov %p2522_p1 }
  0x73   : > { %p1763_p13 = scmp.ne.s32.totalorder %s2189_s15, %s1762_s25  ;;  %s1912_s10 = smov [#allocation8]  }
  0x74   : > { %s1767_s16 = sshll.u32 %s1912_s10, 4  ;;  %s1768_s16 = int_to_ptr.vmem [resolvable:$false] %s1767_s16 }
  0x75   : > { %p1765_p6 = pnand %p1763_p13, %p2523_p11  ;;  %s1769_s18 = scalar_lea.vmem %s1768_s16, 4096 }
  0x76   : > { %p1770_p1 = scmp.lt.s32.totalorder %s2189_s15, %s1768_s16  ;;  %p1771_p0 = scmp.lt.s32.totalorder %s1769_s18, %s1762_s25 }
  0x77   : > { %p1766_p5 = pneg %p1765_p6 }
  0x78   : > { %p1772_p9 = por %p1771_p0, %p1770_p1 }
  0x7a   : > { %p1773_p12 = pnand %p1772_p9, %p1766_p5 }
  0x7c   : > { %1776 = shalt.err (!%p1773_p12)
}
  0x7d   : > { %1471 = dma.hbm_to_vmem [thread:$0]  (!%p2039_p7), %s2187_s13, 2048, %s2189_s15, %s2046_s6, %s1910_s23, %s1910_s23, %s1911_s4  }
  0x7e   : > { %p2524_p3 = scmp.ne.s32.totalorder %s2510_s8, 0 }
  0x7f   : > { %s2221_s20 = sand.u32 (!%p2524_p3), 1, %s1879_s22   ;;  %p2525_p4 = scmp.ne.s32.totalorder (!%p2524_p3), %s2514_s30, 0 }
  0x80   : > { %281 = sbr.rel (%p2524_p3) target bundleno = 737 (0x2e1), region = 40  ;;  %s1333_s27 = sshll.u32 (!%p2524_p3), %s2221_s20, 6 }
  0x81   : > { %s284_s11 = scalar_lea.sflag (!%p2524_p3), [#allocation4], %s2221_s20  ;;  %s2225_s29 = scalar_lea.vmem (!%p2524_p3), [#allocation3], %s1333_s27 }
  0x87   : > { %1850 = dma.done.wait (%p2525_p4), %s284_s11, 1024  }
  0x88   : > { %1852 = vsyncadd (%p2525_p4), %s284_s11, 4294966272  ;;  %s292_s7 = sand.u32 1, %s2082_s12   ;;  %s294_s6 = sand.u32 1, %s1867_s19  }
  0x89   : > { %s1334_s8 = sshll.u32 %s294_s6, 7  ;;  %s293_s23 = scalar_lea.sflag [#allocation7], %s292_s7 }
  0x8a   : > { %s2233_s4 = scalar_lea.vmem [#allocation6], %s1334_s8  ;;  %p2526_p7 = scmp.ne.s32.totalorder %s2516_s17, 0 }
  0x8c   : > { %1854 = dma.done.wait (%p2526_p7), %s293_s23, 4096  }
  0x8d   : > { %1856 = vsyncadd (%p2526_p7), %s293_s23, 4294963200  ;;  %s1336_s15 = sshll.u32 %s2221_s20, 7  ;;  %s1337_s13 = sshll.u32 %s1887_s24, 1 }
  0x8e   : > { %p349_p8 = scmp.lt.s32.totalorder %s1337_s13, 3  ;;  %s2247_s9 = scalar_lea.vmem [#allocation8], %s1334_s8 }
  0x8f   : > { %s2249_s25 = scalar_lea.vmem [#allocation9], %s1336_s15  ;;  %p1338_p10 = scmp.ne.s32.totalorder %s1887_s24, 0 }
  0x90   : > { %s2552_s13 = smov (!%p349_p8, %s1337_s13), 3  ;;  %v1913_v0 = vmov (!%p1338_p10), 0.0  }
  0x91   : > { %s351_s1 = scalar_lea.vmem %s2481_s2, %s2552_s13  ;;  %359 = sbr.rel (%p1338_p10) target bundleno = 153 (0x99), region = 56  ;;  %360 = vst [vmem:[#allocation2] sm:$0xff] (!%p1338_p10), %v1913_v0  ;;  %361 = vst [vmem:[#allocation2 + $0x8] sm:$0xff] (!%p1338_p10), %v1913_v0 }
  0x92   : > { %362 = vst [vmem:[#allocation2 + $0x10] sm:$0xff] (!%p1338_p10), %v1913_v0  ;;  %363 = vst [vmem:[#allocation2 + $0x18] sm:$0xff] (!%p1338_p10), %v1913_v0 }
  0x93   : > { %364 = vst [vmem:[#allocation2 + $0x20] sm:$0xff] (!%p1338_p10), %v1913_v0  ;;  %365 = vst [vmem:[#allocation2 + $0x28] sm:$0xff] (!%p1338_p10), %v1913_v0 }
  0x94   : > { %366 = vst [vmem:[#allocation2 + $0x30] sm:$0xff] (!%p1338_p10), %v1913_v0  ;;  %367 = vst [vmem:[#allocation2 + $0x38] sm:$0xff] (!%p1338_p10), %v1913_v0 }
  0x95   : > { %368 = vst [vmem:[#allocation2 + $0x40] sm:$0xff] (!%p1338_p10), %v1913_v0  ;;  %369 = vst [vmem:[#allocation2 + $0x48] sm:$0xff] (!%p1338_p10), %v1913_v0 }
  0x96   : > { %370 = vst [vmem:[#allocation2 + $0x50] sm:$0xff] (!%p1338_p10), %v1913_v0  ;;  %371 = vst [vmem:[#allocation2 + $0x58] sm:$0xff] (!%p1338_p10), %v1913_v0 }
  0x97   : > { %372 = vst [vmem:[#allocation2 + $0x60] sm:$0xff] (!%p1338_p10), %v1913_v0  ;;  %373 = vst [vmem:[#allocation2 + $0x68] sm:$0xff] (!%p1338_p10), %v1913_v0 }
  0x98   : > { %374 = vst [vmem:[#allocation2 + $0x70] sm:$0xff] %v1913_v0  ;;  %375 = vst [vmem:[#allocation2 + $0x78] sm:$0xff] %v1913_v0 }
  0x99 PF: > { %v1575_v1 = vld [vmem:[%s2233_s4 + $0x4] ss:$8 sps:$4 sm:$0xff]   ;;  %v1577_v2 = vld [vmem:[%s2233_s4] ss:$8 sps:$4 sm:$0xff]   ;;  %v1914_v3 = vmov 0   ;;  %v1601_v24 = vld [vmem:[%s2225_s29 + $0x10] sm:$0xff]   ;;  %v410_v42 = vlaneseq }
  0x9a   : > { %580 = vmatprep.mubr.bf16.mxu0 %v1914_v3  ;;  %548 = vmatprep.subr.bf16.mxu0 %v1575_v1  ;;  %v1578_v4 = vld [vmem:[%s2233_s4 + $0x14] ss:$8 sps:$4 sm:$0xff]   ;;  %v1580_v5 = vld [vmem:[%s2233_s4 + $0x10] ss:$8 sps:$4 sm:$0xff]   ;;  %v1581_v6 = vld [vmem:[%s2233_s4 + $0x24] ss:$8 sps:$4 sm:$0xff]  }
  0x9b   : > { %549 = vmatpush1.bf16.msra.mxu0 %v1577_v2  ;;  %v1583_v7 = vld [vmem:[%s2233_s4 + $0x20] ss:$8 sps:$4 sm:$0xff]   ;;  %v1584_v8 = vld [vmem:[%s2233_s4 + $0x34] ss:$8 sps:$4 sm:$0xff]   ;;  %v1586_v9 = vld [vmem:[%s2233_s4 + $0x30] ss:$8 sps:$4 sm:$0xff]  }
  0x9c   : > { %550 = vmatprep.subr.bf16.mxu0 %v1578_v4  ;;  %v1587_v10 = vld [vmem:[%s2233_s4 + $0x44] ss:$8 sps:$4 sm:$0xff]   ;;  %v1589_v11 = vld [vmem:[%s2233_s4 + $0x40] ss:$8 sps:$4 sm:$0xff]   ;;  %v1590_v12 = vld [vmem:[%s2233_s4 + $0x54] ss:$8 sps:$4 sm:$0xff]  }
  0x9d   : > { %v1592_v13 = vld [vmem:[%s2233_s4 + $0x50] ss:$8 sps:$4 sm:$0xff]   ;;  %v1593_v14 = vld [vmem:[%s2233_s4 + $0x64] ss:$8 sps:$4 sm:$0xff]   ;;  %v1595_v17 = vld [vmem:[%s2233_s4 + $0x60] ss:$8 sps:$4 sm:$0xff]  }
  0x9e   : > { %v1607_v15 = vld [vmem:[%s2247_s9 + $0x40] sm:$0xff]   ;;  %v1609_v18 = vld [vmem:[%s2247_s9 + $0x48] sm:$0xff]   ;;  %v1596_v19 = vld [vmem:[%s2233_s4 + $0x74] ss:$8 sps:$4 sm:$0xff]   ;;  %v411_v43 = vshrl.u32 %v410_v42, 7  ;;  %p1379_p2 = scmp.ne.s32.totalorder %s1887_s24, 1 }
  0x9f   : > { %551 = vmatpush1.bf16.msra.mxu0 %v1580_v5  ;;  %v1608_v16 = vld [vmem:[%s2247_s9] sm:$0xff]   ;;  %1390 = vmatprep.subr.bf16.mxu1 %v1607_v15  ;;  %v1610_v20 = vld [vmem:[%s2247_s9 + $0x8] sm:$0xff]   ;;  %v1598_v21 = vld [vmem:[%s2233_s4 + $0x70] ss:$8 sps:$4 sm:$0xff]   ;;  %s2527_s27 = sld [smem:[#allocation22_spill]] (!%p1379_p2) }
  0xa0   : > { %552 = vmatprep.subr.bf16.mxu0 %v1581_v6  ;;  %1391 = vmatpush3.bf16.msra.mxu1 %v1608_v16  ;;  %v1599_v22 = vld [vmem:[%s2225_s29] sm:$0xff]   ;;  %v1600_v23 = vld [vmem:[%s2225_s29 + $0x8] sm:$0xff]   ;;  %v1602_v25 = vld [vmem:[%s2225_s29 + $0x18] sm:$0xff]   ;;  %v412_v44 = vsub.s32 0, %v411_v43  ;;  %v416_v46 = vsub.s32 1, %v411_v43 }
  0xa1   : > { %1392 = vmatprep.subr.bf16.mxu1 %v1609_v18  ;;  %v1603_v26 = vld [vmem:[%s2225_s29 + $0x20] sm:$0xff]   ;;  %v1604_v27 = vld [vmem:[%s2225_s29 + $0x28] sm:$0xff]   ;;  %v1605_v28 = vld [vmem:[%s2225_s29 + $0x30] sm:$0xff]  }
  0xa2   : > { %v1606_v29 = vld [vmem:[%s2225_s29 + $0x38] sm:$0xff]   ;;  %v1611_v30 = vld [vmem:[%s2247_s9 + $0x50] sm:$0xff]   ;;  %v1615_v34 = vld [vmem:[%s2247_s9 + $0x60] sm:$0xff]  }
  0xa3   : > { %553 = vmatpush1.bf16.msra.mxu0 %v1583_v7  ;;  %v1612_v31 = vld [vmem:[%s2247_s9 + $0x10] sm:$0xff]   ;;  %v1613_v32 = vld [vmem:[%s2247_s9 + $0x58] sm:$0xff]   ;;  %v1616_v35 = vld [vmem:[%s2247_s9 + $0x20] sm:$0xff]  }
  0xa4   : > { %554 = vmatprep.subr.bf16.mxu0 %v1584_v8  ;;  %1393 = vmatpush3.bf16.msra.mxu1 %v1610_v20  ;;  %v1614_v33 = vld [vmem:[%s2247_s9 + $0x18] sm:$0xff]   ;;  %v1617_v36 = vld [vmem:[%s2247_s9 + $0x68] sm:$0xff]   ;;  %v1619_v38 = vld [vmem:[%s2247_s9 + $0x70] sm:$0xff]  }
  0xa5   : > { %1394 = vmatprep.subr.bf16.mxu1 %v1611_v30  ;;  %v1618_v37 = vld [vmem:[%s2247_s9 + $0x28] sm:$0xff]   ;;  %v1620_v39 = vld [vmem:[%s2247_s9 + $0x30] sm:$0xff]   ;;  %v1621_v40 = vld [vmem:[%s2247_s9 + $0x78] sm:$0xff]  }
  0xa6   : > { %v1622_v41 = vld [vmem:[%s2247_s9 + $0x38] sm:$0xff]   ;;  %v408_v45 = vld [vmem:[%s351_s1] sm:$0x3] }
  0xa7   : > { %555 = vmatpush1.bf16.msra.mxu0 %v1586_v9  ;;  %v2297_v47 = vrot.slane %v408_v45, %v412_v44  ;;  %v2299_v48 = vrot.slane %v408_v45, %v416_v46 }
  0xa8   : > { %556 = vmatprep.subr.bf16.mxu0 %v1587_v10  ;;  %1395 = vmatpush3.bf16.msra.mxu1 %v1612_v31 }
  0xa9   : > { %1396 = vmatprep.subr.bf16.mxu1 %v1613_v32 }
  0xab   : > { %557 = vmatpush1.bf16.msra.mxu0 %v1589_v11 }
  0xac   : > { %558 = vmatprep.subr.bf16.mxu0 %v1590_v12  ;;  %1397 = vmatpush3.bf16.msra.mxu1 %v1614_v33 }
  0xad   : > { %1398 = vmatprep.subr.bf16.mxu1 %v1615_v34 }
  0xaf   : > { %559 = vmatpush1.bf16.msra.mxu0 %v1592_v13 }
  0xb0   : > { %560 = vmatprep.subr.bf16.mxu0 %v1593_v14  ;;  %1399 = vmatpush3.bf16.msra.mxu1 %v1616_v35 }
  0xb1   : > { %1400 = vmatprep.subr.bf16.mxu1 %v1617_v36 }
  0xb3   : > { %561 = vmatpush1.bf16.msra.mxu0 %v1595_v17 }
  0xb4   : > { %562 = vmatprep.subr.bf16.mxu0 %v1596_v19  ;;  %1401 = vmatpush3.bf16.msra.mxu1 %v1618_v37 }
  0xb5   : > { %1402 = vmatprep.subr.bf16.mxu1 %v1619_v38 }
  0xb7   : > { %563 = vmatpush1.bf16.msra.mxu0 %v1598_v21 }
  0xb8   : > { %1403 = vmatpush3.bf16.msra.mxu1 %v1620_v39 }
  0xb9   : > { %1404 = vmatprep.subr.bf16.mxu1 %v1621_v40 }
  0xba   : > { %581 = vmatmul.mubr.bf16.vlgmr.msra.gmra.mrb[0].mxu0 %v1599_v22 }
  0xbb   : > { %590 = vmatprep.mubr.bf16.mxu0 %v1914_v3 }
  0xbc   : > { %1405 = vmatpush3.bf16.msra.mxu1 %v1622_v41 }
  0xc2   : > { %591 = vmatmul.mubr.bf16.gmra.mrb[4].mxu0 %v1600_v23 }
  0xc3   : > { %600 = vmatprep.mubr.bf16.mxu0 %v1914_v3 }
  0xca   : > { %601 = vmatmul.mubr.bf16.gmra.mrb[8].mxu0 %v1601_v24 }
  0xcb   : > { %610 = vmatprep.mubr.bf16.mxu0 %v1914_v3 }
  0xd2   : > { %611 = vmatmul.mubr.bf16.gmra.mrb[12].mxu0 %v1602_v25 }
  0xd3   : > { %620 = vmatprep.mubr.bf16.mxu0 %v1914_v3 }
  0xda   : > { %621 = vmatmul.mubr.bf16.gmra.mrb[16].mxu0 %v1603_v26 }
  0xdb   : > { %630 = vmatprep.mubr.bf16.mxu0 %v1914_v3 }
  0xe2   : > { %631 = vmatmul.mubr.bf16.gmra.mrb[20].mxu0 %v1604_v27 }
  0xe3   : > { %640 = vmatprep.mubr.bf16.mxu0 %v1914_v3 }
  0xea   : > { %641 = vmatmul.mubr.bf16.gmra.mrb[24].mxu0 %v1605_v28 }
  0xeb   : > { %650 = vmatprep.mubr.bf16.mxu0 %v1914_v3 }
  0xf2   : > { %651 = vmatmul.mubr.bf16.gmra.mrb[28].mxu0 %v1606_v29 }
 0x18d   : > { %v582_v49 = vpop.f32.mrb[0].mxu0 }
 0x18e   : > { %v583_v50 = vadd.f32 %v582_v49, %v2297_v47  ;;  %v584_v51 = vpop.f32.mrb[1].mxu0 }
 0x18f   : > { %v585_v52 = vadd.f32 %v584_v51, %v2299_v48  ;;  %v586_v53 = vpop.f32.mrb[2].mxu0 }
 0x190   : > { %v693_v54 = vmul.f32 0.70710677, %v583_v50  ;;  %v587_v55 = vadd.f32 %v586_v53, %v2297_v47  ;;  %v588_v56 = vpop.f32.mrb[3].mxu0  ;;  %v661_v13 = vmul.f32 0.5, %v583_v50 }
 0x191   : > { %v694_v57 = vmul.f32 0.70710677, %v585_v52  ;;  %v589_v58 = vadd.f32 %v588_v56, %v2299_v48  ;;  %v662_v23 = vmul.f32 0.5, %v585_v52 }
 0x192   : > { %1623 = verf.f32 %v693_v54  ;;  %v695_v59 = vmul.f32 0.70710677, %v587_v55  ;;  %v663_v18 = vmul.f32 0.5, %v587_v55 }
 0x193   : > { %1625 = verf.f32 %v694_v57  ;;  %v696_v60 = vmul.f32 0.70710677, %v589_v58  ;;  %v664_v29 = vmul.f32 0.5, %v589_v58 }
 0x194   : > { %1627 = verf.f32 %v695_v59 }
 0x195   : > { %1629 = verf.f32 %v696_v60  ;;  %v592_v61 = vpop.f32.mrb[4].mxu0 }
 0x196   : > { %v593_v62 = vadd.f32 %v592_v61, %v2297_v47  ;;  %v594_v63 = vpop.f32.mrb[5].mxu0 }
 0x197   : > { %v595_v0 = vadd.f32 %v594_v63, %v2299_v48  ;;  %v596_v1 = vpop.f32.mrb[6].mxu0 }
 0x198   : > { %v697_v2 = vmul.f32 0.70710677, %v593_v62  ;;  %v597_v3 = vadd.f32 %v596_v1, %v2297_v47  ;;  %v598_v4 = vpop.f32.mrb[7].mxu0  ;;  %v665_v50 = vmul.f32 0.5, %v593_v62 }
 0x199   : > { %v698_v5 = vmul.f32 0.70710677, %v595_v0  ;;  %v599_v6 = vadd.f32 %v598_v4, %v2299_v48  ;;  %v666_v55 = vmul.f32 0.5, %v595_v0 }
 0x19a   : > { %1631 = verf.f32 %v697_v2  ;;  %v699_v7 = vmul.f32 0.70710677, %v597_v3  ;;  %v667_v51 = vmul.f32 0.5, %v597_v3 }
 0x19b   : > { %1633 = verf.f32 %v698_v5  ;;  %v700_v8 = vmul.f32 0.70710677, %v599_v6  ;;  %v668_v56 = vmul.f32 0.5, %v599_v6 }
 0x19c   : > { %v1624_v9 = vpop.eup %1623  ;;  %1635 = verf.f32 %v699_v7 }
 0x19d   : > { %v1626_v10 = vpop.eup %1625  ;;  %1637 = verf.f32 %v700_v8  ;;  %v602_v11 = vpop.f32.mrb[8].mxu0  ;;  %v757_v14 = vadd.f32 1.0, %v1624_v9 }
 0x19e   : > { %v1628_v12 = vpop.eup %1627  ;;  %v2310_v15 = vadd.f32 %v602_v11, %v2297_v47  ;;  %v604_v16 = vpop.f32.mrb[9].mxu0  ;;  %v758_v22 = vadd.f32 1.0, %v1626_v10 }
 0x19f   : > { %v1630_v17 = vpop.eup %1629  ;;  %v759_v19 = vadd.f32 1.0, %v1628_v12  ;;  %v2313_v20 = vadd.f32 %v604_v16, %v2299_v48  ;;  %v606_v21 = vpop.f32.mrb[10].mxu0  ;;  %v789_v32 = vmul.f32 %v757_v14, %v661_v13 }
 0x1a0   : > { %v701_v24 = vmul.f32 0.70710677, %v2310_v15  ;;  %v2317_v25 = vadd.f32 %v606_v21, %v2297_v47  ;;  %v608_v26 = vpop.f32.mrb[11].mxu0  ;;  %v760_v27 = vadd.f32 1.0, %v1630_v17  ;;  %v790_v35 = vmul.f32 %v758_v22, %v662_v23 }
 0x1a1   : > { %v791_v28 = vmul.f32 %v759_v19, %v663_v18  ;;  %v702_v30 = vmul.f32 0.70710677, %v2313_v20  ;;  %v2321_v31 = vadd.f32 %v608_v26, %v2299_v48  ;;  %v669_v17 = vmul.f32 0.5, %v2310_v15 }
 0x1a2   : > { %1639 = verf.f32 %v701_v24  ;;  %v703_v33 = vmul.f32 0.70710677, %v2317_v25  ;;  %v792_v36 = vmul.f32 %v760_v27, %v664_v29  ;;  %v671_v18 = vmul.f32 0.5, %v2317_v25 }
 0x1a3   : > { %1641 = verf.f32 %v702_v30  ;;  %v704_v34 = vmul.f32 0.70710677, %v2321_v31  ;;  %v837_v38 = vpack.c.bf16 %v791_v28, %v789_v32  ;;  %v670_v23 = vmul.f32 0.5, %v2313_v20 }
 0x1a4   : > { %v1632_v37 = vpop.eup %1631  ;;  %1643 = verf.f32 %v703_v33  ;;  %v838_v42 = vpack.c.bf16 %v792_v36, %v790_v35  ;;  %v672_v24 = vmul.f32 0.5, %v2321_v31 }
 0x1a5   : > { %v1634_v39 = vpop.eup %1633  ;;  %v761_v40 = vadd.f32 1.0, %v1632_v37  ;;  %1645 = verf.f32 %v704_v34  ;;  %v612_v41 = vpop.f32.mrb[12].mxu0 }
 0x1a6   : > { %v1636_v43 = vpop.eup %1635  ;;  %v762_v44 = vadd.f32 1.0, %v1634_v39  ;;  %v2326_v45 = vadd.f32 %v612_v41, %v2297_v47  ;;  %v614_v46 = vpop.f32.mrb[13].mxu0  ;;  %1013 = vmatprep.mubr.bf16.mxu1 %v838_v42 }
 0x1a7   : > { %v1638_v49 = vpop.eup %1637  ;;  %v763_v52 = vadd.f32 1.0, %v1636_v43  ;;  %v2329_v53 = vadd.f32 %v614_v46, %v2299_v48  ;;  %v616_v54 = vpop.f32.mrb[14].mxu0  ;;  %1014 = vmatmul.mubr.bf16.vlgmr.msra.gmra.mrb[0].mxu1 %v837_v38  ;;  %v793_v60 = vmul.f32 %v761_v40, %v665_v50 }
 0x1a8   : > { %v764_v57 = vadd.f32 1.0, %v1638_v49  ;;  %v705_v58 = vmul.f32 0.70710677, %v2326_v45  ;;  %v618_v59 = vpop.f32.mrb[15].mxu0  ;;  %v617_v62 = vadd.f32 %v616_v54, %v2297_v47  ;;  %v794_v1 = vmul.f32 %v762_v44, %v666_v55 }
 0x1a9   : > { %v795_v61 = vmul.f32 %v763_v52, %v667_v51  ;;  %v706_v63 = vmul.f32 0.70710677, %v2329_v53  ;;  %v619_v3 = vadd.f32 %v618_v59, %v2299_v48  ;;  %v673_v44 = vmul.f32 0.5, %v2326_v45 }
 0x1aa   : > { %v796_v2 = vmul.f32 %v764_v57, %v668_v56  ;;  %1647 = verf.f32 %v705_v58  ;;  %v707_v4 = vmul.f32 0.70710677, %v617_v62  ;;  %v674_v52 = vmul.f32 0.5, %v2329_v53 }
 0x1ab   : > { %1649 = verf.f32 %v706_v63  ;;  %v839_v0 = vpack.c.bf16 %v795_v61, %v793_v60  ;;  %v708_v6 = vmul.f32 0.70710677, %v619_v3  ;;  %v675_v54 = vmul.f32 0.5, %v617_v62 }
 0x1ac   : > { %v1640_v5 = vpop.eup %1639  ;;  %v840_v7 = vpack.c.bf16 %v796_v2, %v794_v1  ;;  %1651 = verf.f32 %v707_v4  ;;  %v676_v58 = vmul.f32 0.5, %v619_v3 }
 0x1ad   : > { %v1642_v8 = vpop.eup %1641  ;;  %v765_v9 = vadd.f32 1.0, %v1640_v5  ;;  %v622_v10 = vpop.f32.mrb[16].mxu0  ;;  %1653 = verf.f32 %v708_v6 }
 0x1ae   : > { %v1644_v11 = vpop.eup %1643  ;;  %v766_v12 = vadd.f32 1.0, %v1642_v8  ;;  %v2336_v13 = vadd.f32 %v622_v10, %v2297_v47  ;;  %v624_v14 = vpop.f32.mrb[17].mxu0  ;;  %1021 = vmatprep.mubr.bf16.mxu1 %v840_v7 }
 0x1af   : > { %v1646_v16 = vpop.eup %1645  ;;  %v767_v19 = vadd.f32 1.0, %v1644_v11  ;;  %v2341_v21 = vadd.f32 %v624_v14, %v2299_v48  ;;  %v626_v22 = vpop.f32.mrb[18].mxu0  ;;  %1022 = vmatmul.mubr.bf16.gmra.mrb[4].mxu1 %v839_v0  ;;  %v797_v29 = vmul.f32 %v765_v9, %v669_v17 }
 0x1b0   : > { %v768_v26 = vadd.f32 1.0, %v1646_v16  ;;  %v709_v27 = vmul.f32 0.70710677, %v2336_v13  ;;  %v628_v28 = vpop.f32.mrb[19].mxu0  ;;  %v627_v25 = vadd.f32 %v626_v22, %v2297_v47  ;;  %v798_v32 = vmul.f32 %v766_v12, %v670_v23 }
 0x1b1   : > { %v799_v30 = vmul.f32 %v767_v19, %v671_v18  ;;  %v710_v15 = vmul.f32 0.70710677, %v2341_v21  ;;  %v629_v34 = vadd.f32 %v628_v28, %v2299_v48  ;;  %v677_v12 = vmul.f32 0.5, %v2336_v13 }
 0x1b2   : > { %v800_v33 = vmul.f32 %v768_v26, %v672_v24  ;;  %1655 = verf.f32 %v709_v27  ;;  %v711_v20 = vmul.f32 0.70710677, %v627_v25  ;;  %v678_v19 = vmul.f32 0.5, %v2341_v21 }
 0x1b3   : > { %1657 = verf.f32 %v710_v15  ;;  %v841_v35 = vpack.c.bf16 %v799_v30, %v797_v29  ;;  %v712_v36 = vmul.f32 0.70710677, %v629_v34  ;;  %v679_v22 = vmul.f32 0.5, %v627_v25 }
 0x1b4   : > { %v1648_v31 = vpop.eup %1647  ;;  %v842_v37 = vpack.c.bf16 %v800_v33, %v798_v32  ;;  %1659 = verf.f32 %v711_v20  ;;  %v680_v27 = vmul.f32 0.5, %v629_v34 }
 0x1b5   : > { %v1650_v38 = vpop.eup %1649  ;;  %v632_v39 = vpop.f32.mrb[20].mxu0  ;;  %v769_v40 = vadd.f32 1.0, %v1648_v31  ;;  %1661 = verf.f32 %v712_v36 }
 0x1b6   : > { %v2350_v41 = vadd.f32 %v632_v39, %v2297_v47  ;;  %v634_v42 = vpop.f32.mrb[21].mxu0  ;;  %1029 = vmatprep.mubr.bf16.mxu1 %v842_v37  ;;  %v1652_v43 = vpop.eup %1651  ;;  %v770_v46 = vadd.f32 1.0, %v1650_v38 }
 0x1b7   : > { %v2354_v49 = vadd.f32 %v634_v42, %v2299_v48  ;;  %v636_v50 = vpop.f32.mrb[22].mxu0  ;;  %v1654_v51 = vpop.eup %1653  ;;  %v771_v55 = vadd.f32 1.0, %v1652_v43  ;;  %1030 = vmatmul.mubr.bf16.gmra.mrb[8].mxu1 %v841_v35  ;;  %v801_v61 = vmul.f32 %v769_v40, %v673_v44 }
 0x1b8   : > { %v713_v56 = vmul.f32 0.70710677, %v2350_v41  ;;  %v638_v57 = vpop.f32.mrb[23].mxu0  ;;  %v772_v59 = vadd.f32 1.0, %v1654_v51  ;;  %v2360_v45 = vadd.f32 %v636_v50, %v2297_v47  ;;  %v802_v53 = vmul.f32 %v770_v46, %v674_v52 }
 0x1b9   : > { %v714_v60 = vmul.f32 0.70710677, %v2354_v49  ;;  %v803_v63 = vmul.f32 %v771_v55, %v675_v54  ;;  %v2363_v1 = vadd.f32 %v638_v57, %v2299_v48  ;;  %v681_v43 = vmul.f32 0.5, %v2350_v41 }
 0x1ba   : > { %1663 = verf.f32 %v713_v56  ;;  %v804_v62 = vmul.f32 %v772_v59, %v676_v58  ;;  %v715_v2 = vmul.f32 0.70710677, %v2360_v45  ;;  %v682_v52 = vmul.f32 0.5, %v2354_v49 }
 0x1bb   : > { %1665 = verf.f32 %v714_v60  ;;  %v716_v3 = vmul.f32 0.70710677, %v2363_v1  ;;  %v843_v0 = vpack.c.bf16 %v803_v63, %v801_v61  ;;  %v683_v54 = vmul.f32 0.5, %v2360_v45 }
 0x1bc   : > { %v1656_v4 = vpop.eup %1655  ;;  %1667 = verf.f32 %v715_v2  ;;  %v844_v7 = vpack.c.bf16 %v804_v62, %v802_v53  ;;  %v684_v58 = vmul.f32 0.5, %v2363_v1 }
 0x1bd   : > { %v1658_v5 = vpop.eup %1657  ;;  %v642_v6 = vpop.f32.mrb[24].mxu0  ;;  %v773_v8 = vadd.f32 1.0, %v1656_v4  ;;  %1669 = verf.f32 %v716_v3 }
 0x1be   : > { %v2368_v9 = vadd.f32 %v642_v6, %v2297_v47  ;;  %v644_v10 = vpop.f32.mrb[25].mxu0  ;;  %v1660_v11 = vpop.eup %1659  ;;  %v774_v14 = vadd.f32 1.0, %v1658_v5  ;;  %1037 = vmatprep.mubr.bf16.mxu1 %v844_v7 }
 0x1bf   : > { %v2372_v16 = vadd.f32 %v644_v10, %v2299_v48  ;;  %v646_v17 = vpop.f32.mrb[26].mxu0  ;;  %v1662_v18 = vpop.eup %1661  ;;  %v775_v23 = vadd.f32 1.0, %v1660_v11  ;;  %1038 = vmatmul.mubr.bf16.gmra.mrb[12].mxu1 %v843_v0  ;;  %v805_v30 = vmul.f32 %v773_v8, %v677_v12 }
 0x1c0   : > { %v717_v24 = vmul.f32 0.70710677, %v2368_v9  ;;  %v648_v26 = vpop.f32.mrb[27].mxu0  ;;  %v776_v28 = vadd.f32 1.0, %v1662_v18  ;;  %v647_v13 = vadd.f32 %v646_v17, %v2297_v47  ;;  %v806_v33 = vmul.f32 %v774_v14, %v678_v19 }
 0x1c1   : > { %v718_v29 = vmul.f32 0.70710677, %v2372_v16  ;;  %v807_v15 = vmul.f32 %v775_v23, %v679_v22  ;;  %v649_v32 = vadd.f32 %v648_v26, %v2299_v48  ;;  %v685_v8 = vmul.f32 0.5, %v2368_v9 }
 0x1c2   : > { %1671 = verf.f32 %v717_v24  ;;  %v808_v20 = vmul.f32 %v776_v28, %v680_v27  ;;  %v719_v21 = vmul.f32 0.70710677, %v647_v13  ;;  %v687_v10 = vmul.f32 0.5, %v647_v13 }
 0x1c3   : > { %1673 = verf.f32 %v718_v29  ;;  %v720_v35 = vmul.f32 0.70710677, %v649_v32  ;;  %v845_v31 = vpack.c.bf16 %v807_v15, %v805_v30  ;;  %v686_v11 = vmul.f32 0.5, %v2372_v16 }
 0x1c4   : > { %v1664_v25 = vpop.eup %1663  ;;  %1675 = verf.f32 %v719_v21  ;;  %v846_v37 = vpack.c.bf16 %v808_v20, %v806_v33  ;;  %v688_v12 = vmul.f32 0.5, %v649_v32 }
 0x1c5   : > { %v1666_v36 = vpop.eup %1665  ;;  %v652_v34 = vpop.f32.mrb[28].mxu0  ;;  %v777_v38 = vadd.f32 1.0, %v1664_v25  ;;  %1677 = verf.f32 %v720_v35 }
 0x1c6   : > { %v653_v39 = vadd.f32 %v652_v34, %v2297_v47  ;;  %v654_v40 = vpop.f32.mrb[29].mxu0  ;;  %v1668_v42 = vpop.eup %1667  ;;  %v778_v44 = vadd.f32 1.0, %v1666_v36  ;;  %1045 = vmatprep.mubr.bf16.mxu1 %v846_v37 }
 0x1c7   : > { %v655_v46 = vadd.f32 %v654_v40, %v2299_v48  ;;  %v656_v50 = vpop.f32.mrb[30].mxu0  ;;  %v1670_v51 = vpop.eup %1669  ;;  %v779_v55 = vadd.f32 1.0, %v1668_v42  ;;  %1046 = vmatmul.mubr.bf16.gmra.mrb[16].mxu1 %v845_v31  ;;  %v809_v61 = vmul.f32 %v777_v38, %v681_v43  ;;  %v821_v38 = vld [vmem:[#allocation2] sm:$0xff] }
 0x1c8   : > { %v721_v56 = vmul.f32 0.70710677, %v653_v39  ;;  %v658_v57 = vpop.f32.mrb[31].mxu0  ;;  %v780_v59 = vadd.f32 1.0, %v1670_v51  ;;  %v657_v41 = vadd.f32 %v656_v50, %v2297_v47  ;;  %v810_v62 = vmul.f32 %v778_v44, %v682_v52 }
 0x1c9   : > { %v722_v60 = vmul.f32 0.70710677, %v655_v46  ;;  %v811_v63 = vmul.f32 %v779_v55, %v683_v54  ;;  %v659_v53 = vadd.f32 %v658_v57, %v2299_v48  ;;  %v689_v13 = vmul.f32 0.5, %v653_v39  ;;  %v822_v39 = vld [vmem:[#allocation2 + $0x8] sm:$0xff]  ;;  %v823_v54 = vld [vmem:[#allocation2 + $0x10] sm:$0xff] }
 0x1ca   : > { %1679 = verf.f32 %v721_v56  ;;  %v812_v2 = vmul.f32 %v780_v59, %v684_v58  ;;  %v723_v49 = vmul.f32 0.70710677, %v657_v41  ;;  %v691_v15 = vmul.f32 0.5, %v657_v41  ;;  %v824_v58 = vld [vmem:[#allocation2 + $0x18] sm:$0xff] }
 0x1cb   : > { %1681 = verf.f32 %v722_v60  ;;  %v724_v4 = vmul.f32 0.70710677, %v659_v53  ;;  %v847_v3 = vpack.c.bf16 %v811_v63, %v809_v61  ;;  %v690_v16 = vmul.f32 0.5, %v655_v46 }
 0x1cc   : > { %v1672_v45 = vpop.eup %1671  ;;  %1683 = verf.f32 %v723_v49  ;;  %v848_v5 = vpack.c.bf16 %v812_v2, %v810_v62  ;;  %v692_v32 = vmul.f32 0.5, %v659_v53  ;;  %v825_v53 = vld [vmem:[#allocation2 + $0x20] sm:$0xff] }
 0x1cd   : > { %v1674_v0 = vpop.eup %1673  ;;  %v781_v1 = vadd.f32 1.0, %v1672_v45  ;;  %1685 = verf.f32 %v724_v4  ;;  %v826_v45 = vld [vmem:[#allocation2 + $0x28] sm:$0xff] }
 0x1ce   : > { %v1676_v6 = vpop.eup %1675  ;;  %v782_v7 = vadd.f32 1.0, %v1674_v0  ;;  %1053 = vmatprep.mubr.bf16.mxu1 %v848_v5 }
 0x1cf   : > { %v1678_v47 = vpop.eup %1677  ;;  %v783_v48 = vadd.f32 1.0, %v1676_v6  ;;  %1054 = vmatmul.mubr.bf16.gmra.mrb[20].mxu1 %v847_v3  ;;  %v813_v17 = vmul.f32 %v781_v1, %v685_v8  ;;  %v827_v6 = vld [vmem:[#allocation2 + $0x30] sm:$0xff] }
 0x1d0   : > { %v784_v14 = vadd.f32 1.0, %v1678_v47  ;;  %v814_v19 = vmul.f32 %v782_v7, %v686_v11 }
 0x1d1   : > { %v815_v18 = vmul.f32 %v783_v48, %v687_v10  ;;  %v828_v10 = vld [vmem:[#allocation2 + $0x38] sm:$0xff] }
 0x1d2   : > { %v816_v22 = vmul.f32 %v784_v14, %v688_v12 }
 0x1d3   : > { %v849_v24 = vpack.c.bf16 %v815_v18, %v813_v17  ;;  %v829_v18 = vld [vmem:[#allocation2 + $0x40] sm:$0xff] }
 0x1d4   : > { %v1680_v23 = vpop.eup %1679  ;;  %v850_v27 = vpack.c.bf16 %v816_v22, %v814_v19 }
 0x1d5   : > { %v1682_v26 = vpop.eup %1681  ;;  %v785_v28 = vadd.f32 1.0, %v1680_v23 }
 0x1d6   : > { %v1684_v29 = vpop.eup %1683  ;;  %v786_v30 = vadd.f32 1.0, %v1682_v26  ;;  %1061 = vmatprep.mubr.bf16.mxu1 %v850_v27 }
 0x1d7   : > { %v1686_v9 = vpop.eup %1685  ;;  %v787_v33 = vadd.f32 1.0, %v1684_v29  ;;  %1062 = vmatmul.mubr.bf16.gmra.mrb[24].mxu1 %v849_v24  ;;  %v817_v21 = vmul.f32 %v785_v28, %v689_v13  ;;  %v830_v24 = vld [vmem:[#allocation2 + $0x48] sm:$0xff] }
 0x1d8   : > { %v788_v20 = vadd.f32 1.0, %v1686_v9  ;;  %v818_v35 = vmul.f32 %v786_v30, %v690_v16  ;;  %v831_v9 = vld [vmem:[#allocation2 + $0x50] sm:$0xff]  ;;  %v832_v16 = vld [vmem:[#allocation2 + $0x58] sm:$0xff] }
 0x1d9   : > { %v819_v25 = vmul.f32 %v787_v33, %v691_v15 }
 0x1da   : > { %v820_v31 = vmul.f32 %v788_v20, %v692_v32 }
 0x1db   : > { %v851_v36 = vpack.c.bf16 %v819_v25, %v817_v21 }
 0x1dc   : > { %v852_v34 = vpack.c.bf16 %v820_v31, %v818_v35  ;;  %v833_v31 = vld [vmem:[#allocation2 + $0x60] sm:$0xff] }
 0x1de   : > { %1069 = vmatprep.mubr.bf16.mxu1 %v852_v34 }
 0x1df   : > { %1070 = vmatmul.mubr.bf16.gmra.mrb[28].mxu1 %v851_v36 }
 0x27a   : > { %v1406_v37 = vpop.f32.mrb[0].mxu1 }
 0x27b   : > { %v1407_v40 = vpop.f32.mrb[1].mxu1 }
 0x27c   : > { %v1408_v42 = vadd.f32 %v1407_v40, %v1406_v37  ;;  %v1409_v43 = vpop.f32.mrb[2].mxu1 }
 0x27d   : > { %v1410_v44 = vpop.f32.mrb[3].mxu1 }
 0x27e   : > { %v1078_v50 = vadd.f32 %v1408_v42, %v821_v38  ;;  %v1411_v51 = vadd.f32 %v1410_v44, %v1409_v43  ;;  %v834_v38 = vld [vmem:[#allocation2 + $0x68] sm:$0xff] }
 0x280   : > { %1094 = vst [vmem:[#allocation2] sm:$0xff] %v1078_v50  ;;  %v1079_v46 = vadd.f32 %v1411_v51, %v822_v39  ;;  %v835_v50 = vld [vmem:[#allocation2 + $0x70] sm:$0xff] }
 0x282   : > { %1095 = vst [vmem:[#allocation2 + $0x8] sm:$0xff] %v1079_v46  ;;  %v1412_v52 = vpop.f32.mrb[4].mxu1 }
 0x283   : > { %v1413_v55 = vpop.f32.mrb[5].mxu1 }
 0x284   : > { %v1414_v56 = vadd.f32 %v1413_v55, %v1412_v52  ;;  %v1415_v57 = vpop.f32.mrb[6].mxu1 }
 0x285   : > { %v1416_v59 = vpop.f32.mrb[7].mxu1 }
 0x286   : > { %v1080_v60 = vadd.f32 %v1414_v56, %v823_v54  ;;  %v1417_v41 = vadd.f32 %v1416_v59, %v1415_v57  ;;  %v836_v54 = vld [vmem:[#allocation2 + $0x78] sm:$0xff] }
 0x287   : > { %v1114_v59 = vld [vmem:[#allocation2] sm:$0xff] (!%p1379_p2) }
 0x288   : > { %1096 = vst [vmem:[#allocation2 + $0x10] sm:$0xff] %v1080_v60  ;;  %v1081_v61 = vadd.f32 %v1417_v41, %v824_v58  ;;  %v1380_v60 = vld [vmem:[%s2527_s27] ss:$0 sm:$0xff] (!%p1379_p2) }
 0x289   : > { %v1115_v41 = vld [vmem:[#allocation2 + $0x8] sm:$0xff] (!%p1379_p2) }
 0x28a   : > { %1097 = vst [vmem:[#allocation2 + $0x18] sm:$0xff] %v1081_v61  ;;  %v1418_v63 = vpop.f32.mrb[8].mxu1  ;;  %v1137_v61 = vadd.f32 (!%p1379_p2), %v1380_v60, %v1114_v59 }
 0x28b   : > { %v1419_v62 = vpop.f32.mrb[9].mxu1 }
 0x28c   : > { %v1420_v2 = vadd.f32 %v1419_v62, %v1418_v63  ;;  %v1421_v49 = vpop.f32.mrb[10].mxu1  ;;  %v1138_v63 = vadd.f32 (!%p1379_p2), %v1380_v60, %v1115_v41  ;;  %1153 = vst [vmem:[%s2249_s25] sm:$0xff] (!%p1379_p2), %v1137_v61 }
 0x28d   : > { %v1422_v4 = vpop.f32.mrb[11].mxu1 }
 0x28e   : > { %v1082_v3 = vadd.f32 %v1420_v2, %v825_v53  ;;  %v1423_v0 = vadd.f32 %v1422_v4, %v1421_v49  ;;  %1154 = vst [vmem:[%s2249_s25 + $0x8] sm:$0xff] (!%p1379_p2), %v1138_v63 }
 0x28f   : > { %v1116_v53 = vld [vmem:[#allocation2 + $0x10] sm:$0xff] (!%p1379_p2) }
 0x290   : > { %1098 = vst [vmem:[#allocation2 + $0x20] sm:$0xff] %v1082_v3  ;;  %v1083_v5 = vadd.f32 %v1423_v0, %v826_v45  ;;  %v1139_v49 = vadd.f32 (!%p1379_p2), %v1380_v60, %v1116_v53 }
 0x291   : > { %v1117_v62 = vld [vmem:[#allocation2 + $0x18] sm:$0xff] (!%p1379_p2) }
 0x292   : > { %1099 = vst [vmem:[#allocation2 + $0x28] sm:$0xff] %v1083_v5  ;;  %v1424_v1 = vpop.f32.mrb[12].mxu1  ;;  %v1140_v45 = vadd.f32 (!%p1379_p2), %v1380_v60, %v1117_v62  ;;  %1155 = vst [vmem:[%s2249_s25 + $0x10] sm:$0xff] (!%p1379_p2), %v1139_v49 }
 0x293   : > { %v1425_v7 = vpop.f32.mrb[13].mxu1 }
 0x294   : > { %v1426_v47 = vadd.f32 %v1425_v7, %v1424_v1  ;;  %v1427_v8 = vpop.f32.mrb[14].mxu1  ;;  %1156 = vst [vmem:[%s2249_s25 + $0x18] sm:$0xff] (!%p1379_p2), %v1140_v45 }
 0x295   : > { %v1428_v48 = vpop.f32.mrb[15].mxu1 }
 0x296   : > { %v1084_v11 = vadd.f32 %v1426_v47, %v827_v6  ;;  %v1429_v12 = vadd.f32 %v1428_v48, %v1427_v8 }
 0x297   : > { %v1118_v2 = vld [vmem:[#allocation2 + $0x20] sm:$0xff] (!%p1379_p2) }
 0x298   : > { %1100 = vst [vmem:[#allocation2 + $0x30] sm:$0xff] %v1084_v11  ;;  %v1085_v14 = vadd.f32 %v1429_v12, %v828_v10  ;;  %v1141_v4 = vadd.f32 (!%p1379_p2), %v1380_v60, %v1118_v2 }
 0x299   : > { %v1119_v3 = vld [vmem:[#allocation2 + $0x28] sm:$0xff] (!%p1379_p2) }
 0x29a   : > { %1101 = vst [vmem:[#allocation2 + $0x38] sm:$0xff] %v1085_v14  ;;  %v1430_v17 = vpop.f32.mrb[16].mxu1  ;;  %v1142_v1 = vadd.f32 (!%p1379_p2), %v1380_v60, %v1119_v3  ;;  %1157 = vst [vmem:[%s2249_s25 + $0x20] sm:$0xff] (!%p1379_p2), %v1141_v4 }
 0x29b   : > { %v1431_v19 = vpop.f32.mrb[17].mxu1 }
 0x29c   : > { %v1432_v22 = vadd.f32 %v1431_v19, %v1430_v17  ;;  %v1433_v23 = vpop.f32.mrb[18].mxu1  ;;  %1158 = vst [vmem:[%s2249_s25 + $0x28] sm:$0xff] (!%p1379_p2), %v1142_v1 }
 0x29d   : > { %v1434_v26 = vpop.f32.mrb[19].mxu1 }
 0x29e   : > { %v1086_v27 = vadd.f32 %v1432_v22, %v829_v18  ;;  %v1435_v28 = vadd.f32 %v1434_v26, %v1433_v23 }
 0x29f   : > { %v1120_v0 = vld [vmem:[#allocation2 + $0x30] sm:$0xff] (!%p1379_p2) }
 0x2a0   : > { %1102 = vst [vmem:[#allocation2 + $0x40] sm:$0xff] %v1086_v27  ;;  %v1087_v29 = vadd.f32 %v1435_v28, %v830_v24  ;;  %v1143_v6 = vadd.f32 (!%p1379_p2), %v1380_v60, %v1120_v0 }
 0x2a1   : > { %v1121_v5 = vld [vmem:[#allocation2 + $0x38] sm:$0xff] (!%p1379_p2) }
 0x2a2   : > { %1103 = vst [vmem:[#allocation2 + $0x48] sm:$0xff] %v1087_v29  ;;  %v1436_v30 = vpop.f32.mrb[20].mxu1  ;;  %v1144_v7 = vadd.f32 (!%p1379_p2), %v1380_v60, %v1121_v5  ;;  %1159 = vst [vmem:[%s2249_s25 + $0x30] sm:$0xff] (!%p1379_p2), %v1143_v6 }
 0x2a3   : > { %v1437_v13 = vpop.f32.mrb[21].mxu1 }
 0x2a4   : > { %v1438_v15 = vadd.f32 %v1437_v13, %v1436_v30  ;;  %v1439_v33 = vpop.f32.mrb[22].mxu1  ;;  %1160 = vst [vmem:[%s2249_s25 + $0x38] sm:$0xff] (!%p1379_p2), %v1144_v7 }
 0x2a5   : > { %v1440_v32 = vpop.f32.mrb[23].mxu1 }
 0x2a6   : > { %v1088_v20 = vadd.f32 %v1438_v15, %v831_v9  ;;  %v1441_v21 = vadd.f32 %v1440_v32, %v1439_v33 }
 0x2a7   : > { %v1122_v47 = vld [vmem:[#allocation2 + $0x40] sm:$0xff] (!%p1379_p2) }
 0x2a8   : > { %1104 = vst [vmem:[#allocation2 + $0x50] sm:$0xff] %v1088_v20  ;;  %v1089_v25 = vadd.f32 %v1441_v21, %v832_v16  ;;  %v1145_v48 = vadd.f32 (!%p1379_p2), %v1380_v60, %v1122_v47 }
 0x2a9   : > { %v1123_v8 = vld [vmem:[#allocation2 + $0x48] sm:$0xff] (!%p1379_p2) }
 0x2aa   : > { %1105 = vst [vmem:[#allocation2 + $0x58] sm:$0xff] %v1089_v25  ;;  %v1442_v35 = vpop.f32.mrb[24].mxu1  ;;  %v1146_v11 = vadd.f32 (!%p1379_p2), %v1380_v60, %v1123_v8  ;;  %1161 = vst [vmem:[%s2249_s25 + $0x40] sm:$0xff] (!%p1379_p2), %v1145_v48 }
 0x2ab   : > { %v1443_v36 = vpop.f32.mrb[25].mxu1 }
 0x2ac   : > { %v1444_v34 = vadd.f32 %v1443_v36, %v1442_v35  ;;  %v1445_v37 = vpop.f32.mrb[26].mxu1  ;;  %1162 = vst [vmem:[%s2249_s25 + $0x48] sm:$0xff] (!%p1379_p2), %v1146_v11 }
 0x2ad   : > { %v1446_v40 = vpop.f32.mrb[27].mxu1 }
 0x2ae   : > { %v1090_v42 = vadd.f32 %v1444_v34, %v833_v31  ;;  %v1447_v43 = vadd.f32 %v1446_v40, %v1445_v37 }
 0x2af   : > { %v1124_v10 = vld [vmem:[#allocation2 + $0x50] sm:$0xff] (!%p1379_p2) }
 0x2b0   : > { %1106 = vst [vmem:[#allocation2 + $0x60] sm:$0xff] %v1090_v42  ;;  %v1091_v39 = vadd.f32 %v1447_v43, %v834_v38  ;;  %v1147_v12 = vadd.f32 (!%p1379_p2), %v1380_v60, %v1124_v10 }
 0x2b1   : > { %v1125_v14 = vld [vmem:[#allocation2 + $0x58] sm:$0xff] (!%p1379_p2) }
 0x2b2   : > { %1107 = vst [vmem:[#allocation2 + $0x68] sm:$0xff] %v1091_v39  ;;  %v1448_v44 = vpop.f32.mrb[28].mxu1  ;;  %v1148_v19 = vadd.f32 (!%p1379_p2), %v1380_v60, %v1125_v14  ;;  %1163 = vst [vmem:[%s2249_s25 + $0x50] sm:$0xff] (!%p1379_p2), %v1147_v12 }
 0x2b3   : > { %v1449_v51 = vpop.f32.mrb[29].mxu1 }
 0x2b4   : > { %v1450_v46 = vadd.f32 %v1449_v51, %v1448_v44  ;;  %v1451_v52 = vpop.f32.mrb[30].mxu1  ;;  %1113 = sbr.rel (%p1379_p2) target bundleno = 709 (0x2c5), region = 60  ;;  %1164 = vst [vmem:[%s2249_s25 + $0x58] sm:$0xff] (!%p1379_p2), %v1148_v19 }
 0x2b5   : > { %v1452_v55 = vpop.f32.mrb[31].mxu1 }
 0x2b6   : > { %v1092_v56 = vadd.f32 %v1450_v46, %v835_v50  ;;  %v1453_v57 = vadd.f32 %v1452_v55, %v1451_v52 }
 0x2b7   : > { %v1126_v17 = vld [vmem:[#allocation2 + $0x60] sm:$0xff] (!%p1379_p2) }
 0x2b8   : > { %1108 = vst [vmem:[#allocation2 + $0x70] sm:$0xff] %v1092_v56  ;;  %v1093_v58 = vadd.f32 %v1453_v57, %v836_v54  ;;  %v1149_v22 = vadd.f32 (!%p1379_p2), %v1380_v60, %v1126_v17 }
 0x2b9   : > { %v1127_v18 = vld [vmem:[#allocation2 + $0x68] sm:$0xff] (!%p1379_p2) }
 0x2ba   : > { %1109 = vst [vmem:[#allocation2 + $0x78] sm:$0xff] %v1093_v58  ;;  %v1150_v23 = vadd.f32 (!%p1379_p2), %v1380_v60, %v1127_v18  ;;  %1165 = vst [vmem:[%s2249_s25 + $0x60] sm:$0xff] (!%p1379_p2), %v1149_v22 }
 0x2bc   : > { %1166 = vst [vmem:[%s2249_s25 + $0x68] sm:$0xff] %v1150_v23 }
 0x2bf   : > { %v1128_v24 = vld [vmem:[#allocation2 + $0x70] sm:$0xff] }
 0x2c0   : > { %v1151_v27 = vadd.f32 %v1380_v60, %v1128_v24 }
 0x2c1   : > { %v1129_v26 = vld [vmem:[#allocation2 + $0x78] sm:$0xff] }
 0x2c2   : > { %v1152_v28 = vadd.f32 %v1380_v60, %v1129_v26  ;;  %1167 = vst [vmem:[%s2249_s25 + $0x70] sm:$0xff] %v1151_v27 }
 0x2c4   : > { %1168 = vst [vmem:[%s2249_s25 + $0x78] sm:$0xff] %v1152_v28 }
 0x2c5 PF: > { %s2528_s24 = sld [smem:[#allocation15_spill]]  ;;  %s1183_s23 = sshll.u32 %s2249_s25, 4  ;;  %s2416_s23 = int_to_ptr.vmem [resolvable:$true] %s1183_s23 }
 0x2c6   : > { %s2529_s6 = sld [smem:[#allocation23_spill]]  ;;  %s1170_s4 = scalar_lea.sflag [#allocation5], %s2221_s20 }
 0x2c7   : > { %s1777_s15 = scalar_lea.vmem %s2416_s23, 2048  ;;  %p2530_p11 = scmp.ne.s32.totalorder %s2517_s14, 0 }
 0x2c8   : > { %p1778_p13 = scmp.ne.s32.totalorder %s2416_s23, %s1777_s15  ;;  %s1915_s13 = smov [#allocation9]  }
 0x2c9   : > { %s1781_s30 = sshll.u32 %s1915_s13, 4  ;;  %s1782_s30 = int_to_ptr.vmem [resolvable:$false] %s1781_s30 }
 0x2ca   : > { %p1779_p6 = pnand %p1778_p13, %p2530_p11  ;;  %s1783_s12 = scalar_lea.vmem %s1782_s30, 4096 }
 0x2cb   : > { %s1389_s11 = sshll.u32 %s2528_s24, 11  ;;  %p1784_p1 = scmp.lt.s32.totalorder %s2416_s23, %s1782_s30 }
 0x2cc   : > { %s2413_s8 = scalar_lea.hbm %s2529_s6, %s1389_s11  ;;  %p1780_p5 = pneg %p1779_p6 }
 0x2cd   : > { %p1785_p0 = scmp.lt.s32.totalorder %s1783_s12, %s1777_s15 }
 0x2cf   : > { %p1786_p9 = por %p1785_p0, %p1784_p1 }
 0x2d1   : > { %p1787_p12 = pnand %p1786_p9, %p1780_p5 }
 0x2d3   : > { %1790 = shalt.err (!%p1787_p12)
}
 0x2d4   : > { %s1791_s1 = scalar_lea.hbm %s2413_s8, 2048  ;;  %s1795_s17 = scalar_lea.hbm %s2529_s6, 4096 }
 0x2d5   : > { %p1792_p3 = scmp.ne.s32.totalorder %s2413_s8, %s1791_s1  ;;  %p1796_p8 = scmp.lt.u32.totalorder %s2413_s8, %s2529_s6 }
 0x2d6   : > { %p1797_p10 = scmp.lt.u32.totalorder %s1795_s17, %s1791_s1  ;;  %p1799_p13 = scmp.lt.u32.totalorder %s1791_s1, %s2413_s8 }
 0x2d7   : > { %p1793_p4 = pnand %p1792_p3, %p2530_p11 }
 0x2d8   : > { %p1798_p2 = por %p1797_p10, %p1796_p8 }
 0x2d9   : > { %p1794_p7 = pneg %p1793_p4 }
 0x2da   : > { %p1800_p6 = por %p1799_p13, %p1798_p2 }
 0x2dc   : > { %p1801_p5 = pnand %p1800_p6, %p1794_p7 }
 0x2de   : > { %1804 = shalt.err (!%p1801_p5)
}
 0x2df   : > { %s1916_s18 = smov 128   ;;  %s1917_s27 = smov 8  }
 0x2e0   : > { %1460 = dma.vmem_to_hbm [thread:$0]  (%p2530_p11), %s2416_s23, 2048, %s2413_s8, %s1170_s4, %s1916_s18, %s1916_s18, %s1917_s27  }
 0x2e1 PF: > { %p1477_p1 = scmp.ge.s32.totalorder %s1903_s28, 2  ;;  %s1198_s24 = sand.u32 1, %s1875_s21  }
 0x2e2   : > { %p2531_p0 = scmp.ne.s32.totalorder %s2519_s5, 0  ;;  %s1199_s11 = scalar_lea.sflag [#allocation5], %s1198_s24 }
 0x2e4   : > { %p1473_p9 = pnand %p1477_p1, %p2531_p0 }
 0x2e6   : > { %1858 = dma.done.wait (!%p1473_p9), %s1199_s11, 2048  }
 0x2e7   : > { %1860 = vsyncadd (!%p1473_p9), %s1199_s11, 4294965248  ;;  %s24_s28 = sadd.s32 1, %s1903_s28   ;;  %s2532_s29 = sld [smem:[#allocation13_spill]] }
 0x2e8   : > { %p21_p12 = scmp.ge.s32.totalorder %s24_s28, 6   ;;  %s2533_s20 = sld [smem:[#allocation18_spill]] }
 0x2e9   : > { %s2534_s14 = sld [smem:[#allocation14_spill]]  ;;  %s2535_s23 = sld [smem:[#allocation20_spill]] }
 0x2ea   : > { %s2536_s25 = sld [smem:[#allocation16_spill]]  ;;  %s2537_s7 = sld [smem:[#allocation17_spill]] }
 0x2eb   : > { %s2538_s27 = sld [smem:[#allocation19_spill]]  ;;  %s2539_s18 = smov %s1867_s19 }
 0x2ec   : > { %s2541_s21 = smov %s1879_s22  ;;  %s2543_s24 = smov %s1895_s26 }
 0x2ed   : > { %s2540_s19 = smov %s2532_s29  ;;  %23 = sbr.rel (!%p21_p12) target bundleno = 15 (0xf), region = 120 }
 0x2ef   : > { %s2542_s22 = smov %s2534_s14 }
 0x2f0   : > { %s2544_s26 = smov %s2537_s7 }
 0x2f4   :  { %1204 = vsyncpa [#allocation4], 1 }
 0x2f5   :  { %1206 = vsyncpa [#allocation4 + $0x1], 1 }
 0x2f6   :  { %1207 = vsyncpa [#allocation7], 1 }
 0x2f7   :  { %1209 = vsyncpa [#allocation7 + $0x1], 1 }
 0x2f8   :  { %1210 = vsyncpa [#allocation5], 1 }
 0x2f9   :  { %1212 = vsyncpa [#allocation5 + $0x1], 1 }

</bundles_post_ra>
